<compile_context>
chip_gen: v7x
topology: tpu7x:2x2x1
jax: 0.10.0
libtpu: 0.0.40
codegen_flags: <defaults>
</compile_context>

<pallas_src>
import functools

import jax
import jax.numpy as jnp
from jax import lax
from jax.experimental import pallas as pl
from jax.experimental.pallas import tpu as pltpu

TIME2VEC_ABSPOS_MULTIPLIER = 0.0001
TIME2VEC_AGE_MULTIPLIER = 0.01
TIME2VEC_MAX_CLIP = 100.0
TIME2VEC_MIN_CLIP = -100.0
LAYER_NORM_EPS = 1e-12


def _round_up(x, m):
    return ((x + m - 1) // m) * m


def ehr_embeddings_kernel(ids_ref, tok_ref, ctab_ref, params_ref, out_ref,
                          staging_ref, sem_ref, *,
                          h_true, chunk, n_chunks, n_seg):
    """One (TQ, H_pad) token tile.

    ids_ref    : (N_pad,) int32 in SMEM (scalar prefetch) — concept ids
    tok_ref    : (TQ, 4)  f32   columns = [segment, age, abspos, pad]
    ctab_ref   : (V, H_pad) f32 in HBM (memory_space=pl.ANY) — concept table
    params_ref : (6+T, H_pad) f32 rows = [w_age, phi_age, w_abs, phi_abs,
                                          ln_gamma, ln_beta, seg_0..seg_{T-1}]
    out_ref    : (TQ, H_pad) out dtype
    staging_ref: (2, chunk, H_pad) f32 VMEM — double-buffered gather staging
    sem_ref    : (2,) DMA semaphores
    """
    t = pl.program_id(0)
    TQ, H_pad = out_ref.shape

    def issue_gather(c, slot):
        base = t * TQ + c * chunk

        def body(i, carry):
            rid = ids_ref[base + i]
            pltpu.make_async_copy(
                ctab_ref.at[pl.ds(rid, 1), :],
                staging_ref.at[slot, pl.ds(i, 1), :],
                sem_ref.at[slot]).start()
            return carry

        lax.fori_loop(0, chunk, body, 0)

    def wait_gather(slot):
        def body(i, carry):
            # Wait decrements by this copy's size; source offset is irrelevant.
            pltpu.make_async_copy(
                ctab_ref.at[pl.ds(0, 1), :],
                staging_ref.at[slot, pl.ds(i, 1), :],
                sem_ref.at[slot]).wait()
            return carry

        lax.fori_loop(0, chunk, body, 0)

    # Prologue: start the first chunk's row gather immediately.
    issue_gather(0, 0)

    # Hoisted per-tile constants (broadcasts are not CSE'd inside loops).
    col = lax.broadcasted_iota(jnp.int32, (chunk, H_pad), 1)
    lane_ok = col < h_true
    w_age = params_ref[0:1, :]
    phi_age = params_ref[1:2, :]
    w_abs = params_ref[2:3, :]
    phi_abs = params_ref[3:4, :]
    gamma = params_ref[4:5, :]
    beta = params_ref[5:6, :]
    seg_rows = [params_ref[6 + s:7 + s, :] for s in range(n_seg)]

    def time2vec(tau, w_row, phi_row):
        lin = jnp.clip(tau * w_row + phi_row,
                       TIME2VEC_MIN_CLIP, TIME2VEC_MAX_CLIP)
        # column 0 stays linear, the remaining columns are periodic (cos)
        return jnp.where(col == 0, lin, jnp.cos(lin))

    @pl.loop(0, n_chunks)
    def _(c):
        slot = lax.rem(c, 2)

        # Prefetch the next chunk's rows into the other slot (double buffer).
        @pl.when(c + 1 < n_chunks)
        def _():
            issue_gather(c + 1, 1 - slot)

        wait_gather(slot)

        rows = pl.ds(pl.multiple_of(c * chunk, 8), chunk)
        segs = tok_ref[rows, 0:1]                            # (chunk, 1) f32
        age = tok_ref[rows, 1:2]                             # (chunk, 1) f32
        abspos = tok_ref[rows, 2:3]                          # (chunk, 1) f32

        ce = staging_ref[slot]                               # (chunk, H_pad) f32

        # Segment embedding via VPU selects (type vocab is tiny).
        seg_e = jnp.broadcast_to(seg_rows[0], (chunk, H_pad))
        for s in range(1, n_seg):
            seg_e = jnp.where(segs == jnp.float32(s), seg_rows[s], seg_e)

        emb = ce + seg_e + time2vec(age, w_age, phi_age) \
                 + time2vec(abspos, w_abs, phi_abs)          # (chunk, H_pad)

        # LayerNorm over the true hidden dim (mask out padded lanes).
        if h_true == H_pad:
            mean = jnp.sum(emb, axis=-1, keepdims=True) * (1.0 / h_true)
            centered = emb - mean
        else:
            emb = jnp.where(lane_ok, emb, 0.0)
            mean = jnp.sum(emb, axis=-1, keepdims=True) * (1.0 / h_true)
            centered = jnp.where(lane_ok, emb - mean, 0.0)
        var = jnp.sum(centered * centered, axis=-1, keepdims=True) * (1.0 / h_true)
        normed = centered * lax.rsqrt(var + LAYER_NORM_EPS)

        out_ref[rows, :] = (normed * gamma + beta).astype(out_ref.dtype)


def prepare_ehr_params(concept_table, segment_table, t2v_params, ln_params):
    """One-time parameter prep (cache the result; do NOT call per forward)."""
    V, H = concept_table.shape
    H_pad = _round_up(H, 128)
    ctab = concept_table.astype(jnp.float32)
    params = jnp.concatenate([t2v_params.astype(jnp.float32),
                              ln_params.astype(jnp.float32),
                              segment_table.astype(jnp.float32)], axis=0)
    if H_pad != H:
        ctab = jnp.pad(ctab, ((0, 0), (0, H_pad - H)))
        params = jnp.pad(params, ((0, 0), (0, H_pad - H)))
    return ctab, params                                      # (V,H_pad), (6+T,H_pad)


def ehr_embeddings_forward(input_ids, token_type_ids, age, abspos,
                           ctab_padded, params_block, *, hidden_size,
                           tokens_per_tile=1024, gather_chunk=256,
                           out_dtype=jnp.bfloat16):
    B, S = input_ids.shape
    V, H_pad = ctab_padded.shape
    T = params_block.shape[0] - 6
    H = hidden_size
    N = B * S

    # Token-tile / gather-chunk sizing.
    TQ = tokens_per_tile if N >= tokens_per_tile else _round_up(N, 8)
    if TQ >= gather_chunk and TQ % gather_chunk == 0:
        chunk = gather_chunk
    else:
        chunk = TQ
    n_chunks = TQ // chunk
    N_pad = _round_up(N, TQ)

    # Scalar-prefetched concept ids (clamped: PyTorch would raise on OOB).
    ids = jnp.clip(input_ids.reshape(N).astype(jnp.int32), 0, V - 1)
    # Packed per-token scalars: [segment, age, abspos, pad] — one DMA per tile.
    tok = jnp.stack([token_type_ids.reshape(N).astype(jnp.float32),
                     age.reshape(N).astype(jnp.float32),
                     abspos.reshape(N).astype(jnp.float32),
                     jnp.zeros((N,), jnp.float32)], axis=-1)  # (N, 4)
    if N_pad != N:
        ids = jnp.pad(ids, (0, N_pad - N))
        tok = jnp.pad(tok, ((0, N_pad - N), (0, 0)))

    # VMEM budget: small now that the table never enters VMEM.
    out_bytes = jnp.dtype(out_dtype).itemsize
    est = (2 * TQ * 4 * 4                       # packed token scalars
           + 2 * (6 + T) * H_pad * 4            # params block
           + 2 * TQ * H_pad * out_bytes         # output tile (double-buffered)
           + 2 * chunk * H_pad * 4              # gather staging (2 slots)
           + 8 * chunk * H_pad * 4)             # elementwise temporaries
    try:
        vmem_cap = int(pltpu.get_tpu_info().vmem_capacity_bytes)
    except Exception:
        vmem_cap = 64 << 20
    cap = (100 << 20) if vmem_cap >= (128 << 20) else (48 << 20)
    vmem_limit = int(min(max(2 * est, 16 << 20), cap))

    grid = (N_pad // TQ,)

    out = pl.pallas_call(
        functools.partial(ehr_embeddings_kernel, h_true=H, chunk=chunk,
                          n_chunks=n_chunks, n_seg=T),
        out_shape=jax.ShapeDtypeStruct((N_pad, H_pad), out_dtype),
        grid_spec=pltpu.PrefetchScalarGridSpec(
            num_scalar_prefetch=1,               # ids -> SMEM
            grid=grid,
            in_specs=[
                pl.BlockSpec((TQ, 4), lambda t, ids: (t, 0)),        # seg/age/abspos
                pl.BlockSpec(memory_space=pl.ANY),                   # concept table (HBM)
                pl.BlockSpec((6 + T, H_pad), lambda t, ids: (0, 0)), # params block
            ],
            out_specs=pl.BlockSpec((TQ, H_pad), lambda t, ids: (t, 0)),
            scratch_shapes=[pltpu.VMEM((2, chunk, H_pad), jnp.float32),
                            pltpu.SemaphoreType.DMA((2,))],
        ),
        compiler_params=pltpu.CompilerParams(
            dimension_semantics=("parallel",),
            vmem_limit_bytes=vmem_limit),
    )(ids, tok, ctab_padded, params_block)

    return out[:N, :H].reshape(B, S, H)


def ehr_embeddings(input_ids, token_type_ids, age, abspos,
                   concept_table, segment_table, t2v_params, ln_params,
                   **kw):
    """Convenience wrapper (prepare_ehr_params should be cached in real use)."""
    ctab_padded, params_block = prepare_ehr_params(
        concept_table, segment_table, t2v_params, ln_params)
    return ehr_embeddings_forward(input_ids, token_type_ids, age, abspos,
                                  ctab_padded, params_block,
                                  hidden_size=concept_table.shape[1], **kw)


def _reference(input_ids, token_type_ids, age, abspos,
               concept_table, segment_table, t2v_params, ln_params):
    """Pure-JAX reference of the PyTorch forward (eval mode)."""
    H = concept_table.shape[1]
    ce = concept_table[input_ids]
    se = segment_table[token_type_ids]

    def t2v(tau, w, phi):
        lin = tau[..., None] * w[None, None, :] + phi[None, None, :]
        lin = jnp.clip(lin, TIME2VEC_MIN_CLIP, TIME2VEC_MAX_CLIP)
        idx = jnp.arange(H)
        return jnp.where(idx == 0, lin, jnp.cos(lin))

    emb = ce + se + t2v(age, t2v_params[0], t2v_params[1]) \
                  + t2v(abspos, t2v_params[2], t2v_params[3])
    mean = jnp.mean(emb, axis=-1, keepdims=True)
    var = jnp.mean(jnp.square(emb - mean), axis=-1, keepdims=True)
    normed = (emb - mean) / jnp.sqrt(var + LAYER_NORM_EPS)
    return normed * ln_params[0] + ln_params[1]


if __name__ == "__main__":
    B, S, H = 2, 8, 32       # batch, sequence_length, hidden_size
    V, T = 24, 3             # vocab_size, type_vocab_size

    key = jax.random.PRNGKey(0)
    keys = jax.random.split(key, 12)

    # Parameters (synthetic init: nn.Embedding ~ N(0,1), Time2Vec = scale*randn,
    # LayerNorm gamma=1 / beta=0).
    concept_table = jax.random.normal(keys[0], (V, H), jnp.float32)
    segment_table = jax.random.normal(keys[1], (T, H), jnp.float32)

    def t2v_rows(kw0, kphi0, kw, kphi, scale):
        w0 = scale * jax.random.normal(kw0, (1,), jnp.float32)
        phi0 = scale * jax.random.normal(kphi0, (1,), jnp.float32)
        w = scale * jax.random.normal(kw, (H - 1,), jnp.float32)
        phi = scale * jax.random.normal(kphi, (H - 1,), jnp.float32)
        return jnp.concatenate([w0, w]), jnp.concatenate([phi0, phi])

    w_age, phi_age = t2v_rows(keys[2], keys[3], keys[4], keys[5],
                              TIME2VEC_AGE_MULTIPLIER)
    w_abs, phi_abs = t2v_rows(keys[6], keys[7], keys[8], keys[9],
                              TIME2VEC_ABSPOS_MULTIPLIER)
    t2v_params = jnp.stack([w_age, phi_age, w_abs, phi_abs], axis=0)   # (4, H)
    ln_params = jnp.stack([jnp.ones((H,), jnp.float32),
                           jnp.zeros((H,), jnp.float32)], axis=0)      # (2, H)

    # Inputs.
    input_ids = jax.random.randint(keys[10], (B, S), 0, V, jnp.int32)
    token_type_ids = jax.random.randint(keys[11], (B, S), 0, T, jnp.int32)
    age = jax.random.uniform(keys[2], (B, S), jnp.float32, 0.0, 100.0)
    abspos = jax.random.uniform(keys[3], (B, S), jnp.float32, 0.0, 10000.0)

    # One-time parameter prep (would be cached across steps in real use).
    ctab_padded, params_block = prepare_ehr_params(
        concept_table, segment_table, t2v_params, ln_params)

    ref = _reference(input_ids, token_type_ids, age, abspos,
                     concept_table, segment_table, t2v_params, ln_params)

    # f32 output: the DMA row gather is exact, so this matches tightly.
    out_f32 = ehr_embeddings_forward(input_ids, token_type_ids, age, abspos,
                                     ctab_padded, params_block, hidden_size=H,
                                     out_dtype=jnp.float32)
    out_f32 = jax.block_until_ready(out_f32)
    assert out_f32.shape == (B, S, H) and out_f32.dtype == jnp.float32
    assert jnp.allclose(out_f32, ref, atol=1e-4, rtol=1e-4), "mismatch vs f32 reference"

    # bf16 output (default, halves writeback): only output-rounding error.
    out_bf16 = ehr_embeddings_forward(input_ids, token_type_ids, age, abspos,
                                      ctab_padded, params_block, hidden_size=H,
                                      out_dtype=jnp.bfloat16)
    out_bf16 = jax.block_until_ready(out_bf16)
    assert out_bf16.shape == (B, S, H) and out_bf16.dtype == jnp.bfloat16
    assert jnp.allclose(out_bf16.astype(jnp.float32), ref,
                        atol=3e-2, rtol=3e-2), "mismatch vs reference (bf16 out)"

    print("KERNEL_OK")
</pallas_src>

<mosaic_0001>
module attributes {stable_mosaic.version = 11 : i64} {
  func.func @ehr_embeddings_kernel(%arg0: i32, %arg1: memref<16xi32, #tpu.memory_space<smem>>, %arg2: memref<16x4xf32, #tpu.memory_space<vmem>>, %arg3: memref<24x128xf32, #tpu.memory_space<any>>, %arg4: memref<9x128xf32, #tpu.memory_space<vmem>>, %arg5: memref<16x128xf32, #tpu.memory_space<vmem>>, %arg6: memref<2x16x128xf32, #tpu.memory_space<vmem>>, %arg7: memref<2x!tpu.dma_semaphore, #tpu.memory_space<semaphore_mem>>) attributes {dimension_semantics = [#tpu.dimension_semantics<parallel>], iteration_bounds = array<i64: 1>, scalar_prefetch = 1 : i64, scratch_operands = 2 : i64, tpu.core_type = #tpu.core_type<tc>, window_params = [{transform_indices = @transform_0, window_bounds = array<i64: 16, 4>}, {}, {pipeline_mode = #tpu.pipeline_mode<synchronous>, transform_indices = @transform_2, window_bounds = array<i64: 9, 128>}, {transform_indices = @transform_3, window_bounds = array<i64: 16, 128>}]} {
    %c16_i32 = arith.constant 16 : i32
    %0 = arith.muli %arg0, %c16_i32 : i32
    %c0_i32 = arith.constant 0 : i32
    %1 = arith.addi %0, %c0_i32 : i32
    %c0_i32_0 = arith.constant 0 : i32
    %c16_i32_1 = arith.constant 16 : i32
    %2 = arith.addi %c0_i32_0, %c16_i32_1 : i32
    %c1_i32 = arith.constant 1 : i32
    scf.for %arg8 = %c0_i32_0 to %2 step %c1_i32  : i32 {
      %105 = arith.addi %1, %arg8 : i32
      %106 = arith.index_cast %105 : i32 to index
      %107 = memref.load %arg1[%106] : memref<16xi32, #tpu.memory_space<smem>>
      %c0_i32_44 = arith.constant 0 : i32
      %c0_i32_45 = arith.constant 0 : i32
      %c0_i32_46 = arith.constant 0 : i32
      %108 = tpu.memref_slice %arg3[%107, %c0_i32_46] : memref<24x128xf32, #tpu.memory_space<any>> -> memref<1x128xf32, #tpu.memory_space<any>>
      %c0_i32_47 = arith.constant 0 : i32
      %109 = tpu.memref_slice %arg6[%c0_i32_44, %arg8, %c0_i32_47] : memref<2x16x128xf32, #tpu.memory_space<vmem>> -> memref<1x1x128xf32, #tpu.memory_space<vmem>>
      %110 = tpu.memref_squeeze %109 : memref<1x1x128xf32, #tpu.memory_space<vmem>> -> memref<1x128xf32, #tpu.memory_space<vmem>>
      %111 = tpu.memref_slice %arg7[%c0_i32_45] : memref<2x!tpu.dma_semaphore, #tpu.memory_space<semaphore_mem>> -> memref<1x!tpu.dma_semaphore, #tpu.memory_space<semaphore_mem>>
      %112 = tpu.memref_squeeze %111 : memref<1x!tpu.dma_semaphore, #tpu.memory_space<semaphore_mem>> -> memref<!tpu.dma_semaphore, #tpu.memory_space<semaphore_mem>>
      tpu.enqueue_dma source(%108 : memref<1x128xf32, #tpu.memory_space<any>>) target(%110 : memref<1x128xf32, #tpu.memory_space<vmem>>) target_semaphore(%112 : memref<!tpu.dma_semaphore, #tpu.memory_space<semaphore_mem>>)
    }
    %c16_i32_2 = arith.constant 16 : i32
    %3 = tpu.iota {dimensions = array<i32: 1>} : vector<16x128xi32>
    %c32_i32 = arith.constant 32 : i32
    %4 = vector.broadcast %c32_i32 : i32 to vector<16x128xi32>
    %5 = arith.cmpi slt, %3, %4 : vector<16x128xi32>
    %c0 = arith.constant 0 : index
    %c0_3 = arith.constant 0 : index
    %6 = vector.load %arg4[%c0, %c0_3] : memref<9x128xf32, #tpu.memory_space<vmem>>, vector<1x128xf32>
    %c1 = arith.constant 1 : index
    %c0_4 = arith.constant 0 : index
    %7 = vector.load %arg4[%c1, %c0_4] : memref<9x128xf32, #tpu.memory_space<vmem>>, vector<1x128xf32>
    %c2 = arith.constant 2 : index
    %c0_5 = arith.constant 0 : index
    %8 = vector.load %arg4[%c2, %c0_5] : memref<9x128xf32, #tpu.memory_space<vmem>>, vector<1x128xf32>
    %c3 = arith.constant 3 : index
    %c0_6 = arith.constant 0 : index
    %9 = vector.load %arg4[%c3, %c0_6] : memref<9x128xf32, #tpu.memory_space<vmem>>, vector<1x128xf32>
    %c4 = arith.constant 4 : index
    %c0_7 = arith.constant 0 : index
    %10 = vector.load %arg4[%c4, %c0_7] : memref<9x128xf32, #tpu.memory_space<vmem>>, vector<1x128xf32>
    %c5 = arith.constant 5 : index
    %c0_8 = arith.constant 0 : index
    %11 = vector.load %arg4[%c5, %c0_8] : memref<9x128xf32, #tpu.memory_space<vmem>>, vector<1x128xf32>
    %c6 = arith.constant 6 : index
    %c0_9 = arith.constant 0 : index
    %12 = vector.load %arg4[%c6, %c0_9] : memref<9x128xf32, #tpu.memory_space<vmem>>, vector<1x128xf32>
    %c7 = arith.constant 7 : index
    %c0_10 = arith.constant 0 : index
    %13 = vector.load %arg4[%c7, %c0_10] : memref<9x128xf32, #tpu.memory_space<vmem>>, vector<1x128xf32>
    %c8 = arith.constant 8 : index
    %c0_11 = arith.constant 0 : index
    %14 = vector.load %arg4[%c8, %c0_11] : memref<9x128xf32, #tpu.memory_space<vmem>>, vector<1x128xf32>
    %c0_i32_12 = arith.constant 0 : i32
    %c1_i32_13 = arith.constant 1 : i32
    %15 = arith.muli %c0_i32_12, %c1_i32_13 : i32
    %c0_i32_14 = arith.constant 0 : i32
    %16 = arith.addi %c0_i32_14, %15 : i32
    %c2_i32 = arith.constant 2 : i32
    %17 = arith.remsi %16, %c2_i32 : i32
    %c1_i32_15 = arith.constant 1 : i32
    %18 = arith.addi %16, %c1_i32_15 : i32
    %c1_i32_16 = arith.constant 1 : i32
    %19 = arith.cmpi slt, %18, %c1_i32_16 : i32
    %20 = arith.extui %19 : i1 to i32
    %c0_i32_17 = arith.constant 0 : i32
    %21 = arith.cmpi ne, %20, %c0_i32_17 : i32
    scf.if %21 {
      %c1_i32_44 = arith.constant 1 : i32
      %105 = arith.addi %16, %c1_i32_44 : i32
      %c1_i32_45 = arith.constant 1 : i32
      %106 = arith.subi %c1_i32_45, %17 : i32
      %c16_i32_46 = arith.constant 16 : i32
      %107 = arith.muli %arg0, %c16_i32_46 : i32
      %c16_i32_47 = arith.constant 16 : i32
      %108 = arith.muli %105, %c16_i32_47 : i32
      %109 = arith.addi %107, %108 : i32
      %c0_i32_48 = arith.constant 0 : i32
      %c16_i32_49 = arith.constant 16 : i32
      %110 = arith.addi %c0_i32_48, %c16_i32_49 : i32
      %c1_i32_50 = arith.constant 1 : i32
      scf.for %arg8 = %c0_i32_48 to %110 step %c1_i32_50  : i32 {
        %111 = arith.addi %109, %arg8 : i32
        %112 = arith.index_cast %111 : i32 to index
        %113 = memref.load %arg1[%112] : memref<16xi32, #tpu.memory_space<smem>>
        %c0_i32_52 = arith.constant 0 : i32
        %114 = tpu.memref_slice %arg3[%113, %c0_i32_52] : memref<24x128xf32, #tpu.memory_space<any>> -> memref<1x128xf32, #tpu.memory_space<any>>
        %c0_i32_53 = arith.constant 0 : i32
        %115 = tpu.memref_slice %arg6[%106, %arg8, %c0_i32_53] : memref<2x16x128xf32, #tpu.memory_space<vmem>> -> memref<1x1x128xf32, #tpu.memory_space<vmem>>
        %116 = tpu.memref_squeeze %115 : memref<1x1x128xf32, #tpu.memory_space<vmem>> -> memref<1x128xf32, #tpu.memory_space<vmem>>
        %117 = tpu.memref_slice %arg7[%106] : memref<2x!tpu.dma_semaphore, #tpu.memory_space<semaphore_mem>> -> memref<1x!tpu.dma_semaphore, #tpu.memory_space<semaphore_mem>>
        %118 = tpu.memref_squeeze %117 : memref<1x!tpu.dma_semaphore, #tpu.memory_space<semaphore_mem>> -> memref<!tpu.dma_semaphore, #tpu.memory_space<semaphore_mem>>
        tpu.enqueue_dma source(%114 : memref<1x128xf32, #tpu.memory_space<any>>) target(%116 : memref<1x128xf32, #tpu.memory_space<vmem>>) target_semaphore(%118 : memref<!tpu.dma_semaphore, #tpu.memory_space<semaphore_mem>>)
      }
      %c16_i32_51 = arith.constant 16 : i32
    } else {
    }
    %c0_i32_18 = arith.constant 0 : i32
    %c16_i32_19 = arith.constant 16 : i32
    %22 = arith.addi %c0_i32_18, %c16_i32_19 : i32
    %c1_i32_20 = arith.constant 1 : i32
    scf.for %arg8 = %c0_i32_18 to %22 step %c1_i32_20  : i32 {
      %c0_i32_44 = arith.constant 0 : i32
      %c0_i32_45 = arith.constant 0 : i32
      %105 = tpu.memref_slice %arg3[%c0_i32_44, %c0_i32_45] : memref<24x128xf32, #tpu.memory_space<any>> -> memref<1x128xf32, #tpu.memory_space<any>>
      %c0_i32_46 = arith.constant 0 : i32
      %106 = tpu.memref_slice %arg6[%17, %arg8, %c0_i32_46] : memref<2x16x128xf32, #tpu.memory_space<vmem>> -> memref<1x1x128xf32, #tpu.memory_space<vmem>>
      %107 = tpu.memref_squeeze %106 : memref<1x1x128xf32, #tpu.memory_space<vmem>> -> memref<1x128xf32, #tpu.memory_space<vmem>>
      %108 = tpu.memref_slice %arg7[%17] : memref<2x!tpu.dma_semaphore, #tpu.memory_space<semaphore_mem>> -> memref<1x!tpu.dma_semaphore, #tpu.memory_space<semaphore_mem>>
      %109 = tpu.memref_squeeze %108 : memref<1x!tpu.dma_semaphore, #tpu.memory_space<semaphore_mem>> -> memref<!tpu.dma_semaphore, #tpu.memory_space<semaphore_mem>>
      tpu.wait_dma2 semaphore(%109 : memref<!tpu.dma_semaphore, #tpu.memory_space<semaphore_mem>>) src(%105 : memref<1x128xf32, #tpu.memory_space<any>>) dst(%107 : memref<1x128xf32, #tpu.memory_space<vmem>>)
    }
    %c16_i32_21 = arith.constant 16 : i32
    %c16_i32_22 = arith.constant 16 : i32
    %23 = arith.muli %16, %c16_i32_22 : i32
    %24 = tpu.assume_multiple %23, 8 : i32
    %25 = arith.index_cast %24 : i32 to index
    %c0_23 = arith.constant 0 : index
    %26 = vector.load %arg2[%25, %c0_23] : memref<16x4xf32, #tpu.memory_space<vmem>>, vector<16x1xf32>
    %27 = arith.index_cast %24 : i32 to index
    %c1_24 = arith.constant 1 : index
    %28 = vector.load %arg2[%27, %c1_24] : memref<16x4xf32, #tpu.memory_space<vmem>>, vector<16x1xf32>
    %29 = arith.index_cast %24 : i32 to index
    %c2_25 = arith.constant 2 : index
    %30 = vector.load %arg2[%29, %c2_25] : memref<16x4xf32, #tpu.memory_space<vmem>>, vector<16x1xf32>
    %31 = arith.index_cast %17 : i32 to index
    %c0_26 = arith.constant 0 : index
    %c0_27 = arith.constant 0 : index
    %32 = vector.load %arg6[%31, %c0_26, %c0_27] : memref<2x16x128xf32, #tpu.memory_space<vmem>>, vector<1x16x128xf32>
    %33 = vector.shape_cast %32 : vector<1x16x128xf32> to vector<16x128xf32>
    %34 = vector.shape_cast %12 : vector<1x128xf32> to vector<1x128xf32>
    %35 = vector.broadcast %34 : vector<1x128xf32> to vector<16x128xf32>
    %cst = arith.constant 1.000000e+00 : f32
    %36 = vector.broadcast %cst : f32 to vector<16x1xf32>
    %37 = arith.cmpf oeq, %26, %36 : vector<16x1xf32>
    %38 = vector.shape_cast %37 : vector<16x1xi1> to vector<16x1xi1>
    %39 = vector.broadcast %38 : vector<16x1xi1> to vector<16x128xi1>
    %40 = vector.shape_cast %13 : vector<1x128xf32> to vector<1x128xf32>
    %41 = vector.broadcast %40 : vector<1x128xf32> to vector<16x128xf32>
    %42 = arith.select %39, %41, %35 : vector<16x128xi1>, vector<16x128xf32>
    %cst_28 = arith.constant 2.000000e+00 : f32
    %43 = vector.broadcast %cst_28 : f32 to vector<16x1xf32>
    %44 = arith.cmpf oeq, %26, %43 : vector<16x1xf32>
    %45 = vector.shape_cast %44 : vector<16x1xi1> to vector<16x1xi1>
    %46 = vector.broadcast %45 : vector<16x1xi1> to vector<16x128xi1>
    %47 = vector.shape_cast %14 : vector<1x128xf32> to vector<1x128xf32>
    %48 = vector.broadcast %47 : vector<1x128xf32> to vector<16x128xf32>
    %49 = arith.select %46, %48, %42 : vector<16x128xi1>, vector<16x128xf32>
    %50 = arith.addf %33, %49 : vector<16x128xf32>
    %51 = vector.broadcast %28 : vector<16x1xf32> to vector<16x128xf32>
    %52 = vector.broadcast %6 : vector<1x128xf32> to vector<16x128xf32>
    %53 = arith.mulf %51, %52 : vector<16x128xf32>
    %54 = vector.broadcast %7 : vector<1x128xf32> to vector<16x128xf32>
    %55 = arith.addf %53, %54 : vector<16x128xf32>
    %cst_29 = arith.constant -1.000000e+02 : f32
    %cst_30 = arith.constant 1.000000e+02 : f32
    %56 = vector.broadcast %cst_29 : f32 to vector<16x128xf32>
    %57 = arith.maximumf %56, %55 : vector<16x128xf32>
    %58 = vector.broadcast %cst_30 : f32 to vector<16x128xf32>
    %59 = arith.minimumf %58, %57 : vector<16x128xf32>
    %c0_i32_31 = arith.constant 0 : i32
    %60 = vector.broadcast %c0_i32_31 : i32 to vector<16x128xi32>
    %61 = arith.cmpi eq, %3, %60 : vector<16x128xi32>
    %62 = math.cos %59 : vector<16x128xf32>
    %63 = arith.select %61, %59, %62 : vector<16x128xi1>, vector<16x128xf32>
    %64 = arith.addf %50, %63 : vector<16x128xf32>
    %65 = vector.broadcast %30 : vector<16x1xf32> to vector<16x128xf32>
    %66 = vector.broadcast %8 : vector<1x128xf32> to vector<16x128xf32>
    %67 = arith.mulf %65, %66 : vector<16x128xf32>
    %68 = vector.broadcast %9 : vector<1x128xf32> to vector<16x128xf32>
    %69 = arith.addf %67, %68 : vector<16x128xf32>
    %cst_32 = arith.constant -1.000000e+02 : f32
    %cst_33 = arith.constant 1.000000e+02 : f32
    %70 = vector.broadcast %cst_32 : f32 to vector<16x128xf32>
    %71 = arith.maximumf %70, %69 : vector<16x128xf32>
    %72 = vector.broadcast %cst_33 : f32 to vector<16x128xf32>
    %73 = arith.minimumf %72, %71 : vector<16x128xf32>
    %c0_i32_34 = arith.constant 0 : i32
    %74 = vector.broadcast %c0_i32_34 : i32 to vector<16x128xi32>
    %75 = arith.cmpi eq, %3, %74 : vector<16x128xi32>
    %76 = math.cos %73 : vector<16x128xf32>
    %77 = arith.select %75, %73, %76 : vector<16x128xi1>, vector<16x128xf32>
    %78 = arith.addf %64, %77 : vector<16x128xf32>
    %cst_35 = arith.constant 0.000000e+00 : f32
    %79 = vector.broadcast %cst_35 : f32 to vector<16x128xf32>
    %80 = arith.select %5, %78, %79 : vector<16x128xi1>, vector<16x128xf32>
    %cst_36 = arith.constant dense<0.000000e+00> : vector<16xf32>
    %81 = vector.multi_reduction <add>, %80, %cst_36 [1] : vector<16x128xf32> to vector<16xf32>
    %82 = vector.shape_cast %81 : vector<16xf32> to vector<16x1xf32>
    %cst_37 = arith.constant 3.125000e-02 : f32
    %83 = vector.broadcast %cst_37 : f32 to vector<16x1xf32>
    %84 = arith.mulf %82, %83 : vector<16x1xf32>
    %85 = vector.broadcast %84 : vector<16x1xf32> to vector<16x128xf32>
    %86 = arith.subf %80, %85 : vector<16x128xf32>
    %cst_38 = arith.constant 0.000000e+00 : f32
    %87 = vector.broadcast %cst_38 : f32 to vector<16x128xf32>
    %88 = arith.select %5, %86, %87 : vector<16x128xi1>, vector<16x128xf32>
    %89 = arith.mulf %88, %88 : vector<16x128xf32>
    %cst_39 = arith.constant dense<0.000000e+00> : vector<16xf32>
    %90 = vector.multi_reduction <add>, %89, %cst_39 [1] : vector<16x128xf32> to vector<16xf32>
    %91 = vector.shape_cast %90 : vector<16xf32> to vector<16x1xf32>
    %cst_40 = arith.constant 3.125000e-02 : f32
    %92 = vector.broadcast %cst_40 : f32 to vector<16x1xf32>
    %93 = arith.mulf %91, %92 : vector<16x1xf32>
    %cst_41 = arith.constant 9.99999996E-13 : f32
    %94 = vector.broadcast %cst_41 : f32 to vector<16x1xf32>
    %95 = arith.addf %93, %94 : vector<16x1xf32>
    %96 = math.rsqrt %95 : vector<16x1xf32>
    %97 = vector.broadcast %96 : vector<16x1xf32> to vector<16x128xf32>
    %98 = arith.mulf %88, %97 : vector<16x128xf32>
    %99 = vector.broadcast %10 : vector<1x128xf32> to vector<16x128xf32>
    %100 = arith.mulf %98, %99 : vector<16x128xf32>
    %101 = vector.broadcast %11 : vector<1x128xf32> to vector<16x128xf32>
    %102 = arith.addf %100, %101 : vector<16x128xf32>
    %103 = arith.index_cast %24 : i32 to index
    %c0_42 = arith.constant 0 : index
    %104 = vector.load %arg5[%103, %c0_42] : memref<16x128xf32, #tpu.memory_space<vmem>>, vector<16x128xf32>
    tpu.vector_store %arg5[%103, %c0_42], %102 {strides = array<i32>} : memref<16x128xf32, #tpu.memory_space<vmem>>, vector<16x128xf32>,
    %c1_i32_43 = arith.constant 1 : i32
    return
  }
  func.func @transform_0(%arg0: i32, %arg1: memref<16xi32, #tpu.memory_space<smem>>) -> (i32, i32) {
    %c0_i32 = arith.constant 0 : i32
    %c0_i32_0 = arith.constant 0 : i32
    return %arg0, %c0_i32 : i32, i32
  }
  func.func @transform_2(%arg0: i32, %arg1: memref<16xi32, #tpu.memory_space<smem>>) -> (i32, i32) {
    %c0_i32 = arith.constant 0 : i32
    %c0_i32_0 = arith.constant 0 : i32
    %c0_i32_1 = arith.constant 0 : i32
    return %c0_i32, %c0_i32_0 : i32, i32
  }
  func.func @transform_3(%arg0: i32, %arg1: memref<16xi32, #tpu.memory_space<smem>>) -> (i32, i32) {
    %c0_i32 = arith.constant 0 : i32
    %c0_i32_0 = arith.constant 0 : i32
    return %arg0, %c0_i32 : i32, i32
  }
}

</mosaic_0001>

<bundles_post_ra>
// kernel: tpu_custom_call.1
= control target key start
LH: loop header
LB: loop body
LE: loop exit
PB: predicated region body
PF: predicated region fallthrough
CT: control target
= control target key end

     0   :  { %s1379_s0 = inlined_call_operand.vmem [shape: s32[16], index: 0, kind: input, shape index: {}]   ;;  %s1380_s1 = inlined_call_operand.vmem [shape: f32[16,4], index: 1, kind: input, shape index: {}]   ;;  %s1381_s2 = inlined_call_operand.vmem [shape: f32[24,128], index: 2, kind: input, shape index: {}]   ;;  %s1382_s3 = inlined_call_operand.hbm [shape: f32[9,128], index: 3, kind: input, shape index: {}]   ;;  %s1383_s4 = inlined_call_operand.hbm [shape: f32[16,128], index: 4, kind: output, shape index: {}]  }
   0x1   :  { %s9_s17 = sshll.u32 %s1379_s0, 4  ;;  %s10_s17 = int_to_ptr.vmem [resolvable:$true] %s9_s17 }
   0x2   :  { %s821_s18 = scalar_lea.vmem %s10_s17, 16  ;;  %p826_p1 = scmp.lt.s32.totalorder %s10_s17, %s10_s17 }
   0x3   :  { %p822_p0 = scmp.ne.s32.totalorder %s10_s17, %s821_s18  ;;  %p827_p2 = scmp.lt.s32.totalorder %s821_s18, %s821_s18 }
   0x5   :  { %p828_p3 = por %p827_p2, %p826_p1 }
   0x7   :  { %p829_p4 = pnand %p828_p3, %p822_p0 }
   0x9   :  { %832 = shalt.err (!%p829_p4)  }
   0xa   :  { %s901_s19 = smov [#allocation5]  }
   0xb   :  { %12 = dma.vmem_to_smem %s10_s17, 16, %s901_s19, [#allocation4] }
   0xc   :  { %885 = dma.done.wait [#allocation4], 16 }
   0xd   :  { %886 = vsyncadd [#allocation4], 4294967280 }
   0xe   :  { %14 = sfence }
   0xf   :  { %15 = vsyncpa [#allocation7], 0 }
  0x10   :  { %16 = vsyncpa [#allocation8], 0  ;;  %s902_s20 = smov [#allocation6]   ;;  %s833_s23 = scalar_lea.hbm %s1382_s3, 256 }
  0x11   :  { %s24_s21 = sshll.u32 %s902_s20, 4  ;;  %p834_p5 = scmp.ne.s32.totalorder %s1382_s3, %s833_s23  ;;  %s25_s21 = int_to_ptr.vmem [resolvable:$true] %s24_s21 }
  0x12   :  { %p837_p6 = scmp.lt.u32.totalorder %s833_s23, %s1382_s3 }
  0x14   :  { %p839_p7 = pnand %p837_p6, %p834_p5 }
  0x16   :  { %842 = shalt.err (!%p839_p7)
}
  0x17   :  { %s843_s28 = scalar_lea.vmem %s25_s21, 256  ;;  %p848_p9 = scmp.lt.s32.totalorder %s25_s21, %s25_s21 }
  0x18   :  { %p844_p8 = scmp.ne.s32.totalorder %s25_s21, %s843_s28  ;;  %p849_p10 = scmp.lt.s32.totalorder %s843_s28, %s843_s28 }
  0x1a   :  { %p850_p11 = por %p849_p10, %p848_p9 }
  0x1c   :  { %p851_p12 = pnand %p850_p11, %p844_p8 }
  0x1e   :  { %854 = shalt.err (!%p851_p12)
}
  0x1f   :  { %s903_s29 = smov 128   ;;  %s904_s30 = smov 8  }
  0x20   :  { %30 = dma.hbm_to_vmem [thread:$0]  %s1382_s3, 256, %s25_s21, [#allocation7], %s903_s29, %s903_s29, %s904_s30  }
  0x21   :  { %887 = dma.done.wait [#allocation7], 256  }
  0x22   :  { %888 = vsyncadd [#allocation7], 4294967040  ;;  %s893_s7 = smov 0  }
  0x23 LB: > { %s42_s8 = sld [smem:[#allocation5 + %s895_s7]]  ;;  %s44_s12 = scalar_lea.vmem [#allocation2], %s895_s7  ;;  %s895_s7 = sphi %s893_s7, %s40_s7  }
  0x29   : > { %s43_s11 = scalar_lea.vmem %s1381_s2, %s42_s8 }
  0x2a   : > { %v62_v0 = vld [vmem:[%s43_s11] sm:$0x1] }
  0x2b   : > { %63 = vst [vmem:[%s44_s12] sm:$0x1] %v62_v0 }
  0x2c   : > { %88 = vsyncadd [#allocation3], 16  ;;  %s40_s7 = sadd.s32 1, %s895_s7  }
  0x2d   : > { %p37_p13 = scmp.ge.s32.totalorder %s40_s7, 16  }
  0x2e   :  { %v89_v1 = vlaneseq (%p37_p13)  ;;  %v722_v2 = vld [vmem:[#allocation6] ss:$0 sm:$0xff] (%p37_p13)  ;;  %v723_v3 = vld [vmem:[#allocation6 + $0x1] ss:$0 sm:$0xff] (%p37_p13)  ;;  %v734_v4 = vld [vmem:[#allocation6 + $0x2] ss:$0 sm:$0xff] (%p37_p13) }
  0x2f   :  { %39 = sbr.rel (!%p37_p13) target bundleno = 35 (0x23), region = 89  ;;  %v735_v5 = vld [vmem:[#allocation6 + $0x3] ss:$0 sm:$0xff] (%p37_p13)  ;;  %v961_v6 = vld [vmem:[#allocation6 + $0x4] ss:$0 sm:$0xff] (%p37_p13)  ;;  %s897_s3 = smov (%p37_p13), 0  }
  0x30   :  { %v963_v7 = vld [vmem:[#allocation6 + $0x5] ss:$0 sm:$0xff] (%p37_p13)  ;;  %v965_v8 = vand.u32 (%p37_p13), 127, %v89_v1  ;;  %v967_v9 = vld [vmem:[#allocation6 + $0x6] ss:$0 sm:$0xff] (%p37_p13) }
  0x31   :  { %v969_v10 = vld [vmem:[#allocation6 + $0x7] ss:$0 sm:$0xff] (%p37_p13)  ;;  %v971_v11 = vld [vmem:[#allocation6 + $0x8] ss:$0 sm:$0xff] (%p37_p13) }
  0x32   :  { %vm91_vm0 = vcmp.lt.s32.totalorder (%p37_p13), %v965_v8, 32 }
  0x36 LB: > { %889 = dma.done.wait [#allocation3], 16  ;;  %s899_s3 = sphi %s897_s3, %s106_s3  }
  0x37   : > { %890 = vsyncadd [#allocation3], 4294967280  ;;  %s106_s3 = sadd.s32 1, %s899_s3  }
  0x38   : > { %p103_p0 = scmp.ge.s32.totalorder %s106_s3, 16  }
  0x39   :  { %v110_v12 = vld [vmem:[%s1380_s1] sm:$0xff] (%p103_p0)  ;;  %v905_v13 = vmov (%p103_p0), 2   ;;  %v906_v14 = vmov (%p103_p0), 1   ;;  %v111_v15 = vld [vmem:[%s1380_s1 + $0x8] sm:$0xff] (%p103_p0)  ;;  %v907_v16 = vmov (%p103_p0), 0   ;;  %s914_s1 = smov (%p103_p0), [#allocation9]  }
  0x3a   :  { %105 = sbr.rel (!%p103_p0) target bundleno = 54 (0x36), region = 100  ;;  %797 = vset.pattern.permute.xlu1 (%p103_p0), %v905_v13  ;;  %796 = vset.pattern.permute.xlu0 (%p103_p0), %v906_v14  ;;  %vm119_vm1 = vcmp.eq.f32.partialorder (%p103_p0), %v111_v15, 1.0  ;;  %vm118_vm2 = vcmp.eq.f32.partialorder (%p103_p0), %v110_v12, 1.0  ;;  %vm136_vm3 = vcmp.eq.f32.partialorder (%p103_p0), %v110_v12, 2.0  ;;  %vm137_vm4 = vcmp.eq.f32.partialorder (%p103_p0), %v111_v15, 2.0  ;;  %s672_s16 = sshll.u32 (%p103_p0), %s914_s1, 4  ;;  %s673_s16 = int_to_ptr.vmem [resolvable:$true] %s672_s16 }
  0x3b   :  { %394 = vperm.xlu1 (%p103_p0), %797, %v110_v12   ;;  %158 = vperm.xlu0 (%p103_p0), %796, %v110_v12   ;;  %v121_v17 = vsel (%p103_p0), %vm119_vm1, 1, %v907_v16  ;;  %v120_v18 = vsel (%p103_p0), %vm118_vm2, 1, %v907_v16  ;;  %v138_v19 = vsel (%p103_p0), %vm136_vm3, 1, %v907_v16  ;;  %v139_v20 = vsel (%p103_p0), %vm137_vm4, 1, %v907_v16  ;;  %s855_s17 = scalar_lea.vmem (%p103_p0), %s673_s16, 256  ;;  %p860_p2 = scmp.lt.s32.totalorder (%p103_p0), %s673_s16, %s673_s16 }
  0x3c   :  { %v908_v63 = vmov (%p103_p0), 683565275   ;;  %v909_v1 = vmov (%p103_p0), 2475754826   ;;  %p856_p1 = scmp.ne.s32.totalorder (%p103_p0), %s673_s16, %s855_s17  ;;  %p861_p3 = scmp.lt.s32.totalorder (%p103_p0), %s855_s17, %s855_s17 }
  0x3e   :  { %p862_p4 = por (%p103_p0), %p861_p3, %p860_p2 }
  0x3f   :  { %398 = vperm.xlu1 (%p103_p0), %797, %v111_v15   ;;  %163 = vperm.xlu0 (%p103_p0), %796, %v111_v15  }
  0x40   :  { %p863_p5 = pnand (%p103_p0), %p862_p4, %p856_p1 }
  0x43   :  { %799 = vset.pattern.permute.xlu1 %v907_v16  ;;  %798 = vset.pattern.permute.xlu0 %v907_v16 }
  0x44   :  { %126 = vperm.xlu1 %799, %v121_v17   ;;  %123 = vperm.xlu0 %798, %v120_v18   ;;  %v912_v18 = vmov 920167782  }
  0x48   :  { %141 = vperm.xlu1 %799, %v138_v19   ;;  %144 = vperm.xlu0 %798, %v139_v20  }
  0x4c   :  { %800 = vset.pattern.permute.xlu0 %v905_v13  ;;  %v911_v13 = vmov 2102212464  }
  0xba   :  { %v395_v21 = vpop.permute.xlu1 %394  ;;  %v159_v22 = vpop.permute.xlu0 %158 }
  0xbb   :  { %v405_v23 = vmul.f32 %v734_v4, %v395_v21  ;;  %v170_v24 = vmul.f32 %v722_v2, %v159_v22  ;;  %v913_v22 = vmov 1326507024  }
  0xbd   :  { %v411_v25 = vadd.f32 %v735_v5, %v405_v23  ;;  %v176_v26 = vadd.f32 %v723_v3, %v170_v24 }
  0xbe   :  { %v399_v27 = vpop.permute.xlu1 %398  ;;  %v164_v28 = vpop.permute.xlu0 %163 }
  0xbf   :  { %v980_v29 = vclamps-f32 %v411_v25, 100.0  ;;  %v982_v30 = vclamps-f32 %v176_v26, 100.0  ;;  %v406_v31 = vmul.f32 %v734_v4, %v399_v27  ;;  %v171_v32 = vmul.f32 %v722_v2, %v164_v28 }
  0xc1   :  { %v420_v33 = vand.u32 2139095040, %v980_v29  ;;  %v186_v34 = vand.u32 2139095040, %v982_v30  ;;  %v412_v35 = vadd.f32 %v735_v5, %v406_v31  ;;  %v177_v36 = vadd.f32 %v723_v3, %v171_v32 }
  0xc2   :  { %v183_v37 = vand.u32 2147483647, %v982_v30  ;;  %v417_v60 = vand.u32 2147483647, %v980_v29  ;;  %v910_v5 = vmov 2131351028  }
  0xc3   :  { %v421_v38 = vshrl.u32 %v420_v33, 23  ;;  %v187_v39 = vshrl.u32 %v186_v34, 23  ;;  %v987_v40 = vclamps-f32 %v412_v35, 100.0  ;;  %v989_v41 = vclamps-f32 %v177_v36, 100.0 }
  0xc4   :  { %v190_v45 = vand.u32 8388607, %v183_v37 }
  0xc5   :  { %v738_v42 = vadd.s32 4294967169, %v421_v38  ;;  %v726_v43 = vadd.s32 4294967169, %v187_v39  ;;  %v289_v44 = vand.u32 2139095040, %v989_v41  ;;  %v523_v48 = vand.u32 2139095040, %v987_v40 }
  0xc6   :  { %v191_v53 = vor.u32 8388608, %v190_v45 }
  0xc7   :  { %v427_v46 = vadd.s32 1, %v738_v42  ;;  %v193_v47 = vadd.s32 1, %v726_v43  ;;  %v290_v49 = vshrl.u32 %v289_v44, 23  ;;  %v524_v55 = vshrl.u32 %v523_v48, 23 }
  0xc8   :  { %v997_v59 = vshll.u32 %v191_v53, 8 }
  0xc9   :  { %vm428_vm5 = vcmp.gt.s32.totalorder %v427_v46, 0  ;;  %vm194_vm6 = vcmp.gt.s32.totalorder %v193_v47, 0  ;;  %v730_v52 = vadd.s32 4294967169, %v290_v49  ;;  %v742_v62 = vadd.s32 4294967169, %v524_v55 }
  0xca   :  { %v429_v50 = vsel %vm428_vm5, %v427_v46, 0  ;;  %v195_v51 = vsel %vm194_vm6, %v193_v47, 0 }
  0xcb   :  { %v197_v54 = vand.u32 31, %v195_v51  ;;  %v995_v56 = vand.u32 31, %v429_v50  ;;  %v296_v58 = vadd.s32 1, %v730_v52  ;;  %v196_v61 = vshrl.u32 %v195_v51, 5 }
  0xcc   :  { %v1014_v39 = vshrl.u32 %v429_v50, 5  ;;  %v530_v42 = vadd.s32 1, %v742_v62  ;;  %v424_v52 = vand.u32 8388607, %v417_v60 }
  0xcd   :  { %v198_v57 = vsub.s32 32, %v197_v54  ;;  %v200_v0 = vshll.u32 %v908_v63, %v197_v54  ;;  %v1003_v3 = vsub.s32 32, %v995_v56  ;;  %v203_v4 = vshll.u32 %v909_v1, %v197_v54 }
  0xce   :  { %v206_v12 = vshll.u32 %v910_v5, %v197_v54  ;;  %v209_v14 = vshll.u32 %v911_v13, %v197_v54  ;;  %vm297_vm7 = vcmp.gt.s32.totalorder %v296_v58, 0  ;;  %v212_v21 = vshll.u32 %v912_v18, %v197_v54 }
  0xcf   :  { %v201_v2 = vshrl.u32 %v909_v1, %v198_v57  ;;  %v204_v16 = vshrl.u32 %v910_v5, %v198_v57  ;;  %v207_v17 = vshrl.u32 %v911_v13, %v198_v57  ;;  %v210_v19 = vshrl.u32 %v912_v18, %v198_v57 }
  0xd0   :  { %v199_v20 = vshrl.u32 %v908_v63, %v198_v57  ;;  %v213_v23 = vshrl.u32 %v913_v22, %v198_v57  ;;  %vm215_vm8 = vcmp.lt.s32.totalorder %v196_v61, 1  ;;  %vm216_vm9 = vcmp.lt.s32.totalorder %v196_v61, 2 }
  0xd1   :  { %v202_v15 = vor.u32 %v201_v2, %v200_v0  ;;  %v205_v24 = vor.u32 %v204_v16, %v203_v4  ;;  %v208_v25 = vor.u32 %v207_v17, %v206_v12  ;;  %v211_v26 = vor.u32 %v210_v19, %v209_v14 }
  0xd2   :  { %v214_v27 = vor.u32 %v213_v23, %v212_v21  ;;  %vm217_vm10 = vcmp.lt.s32.totalorder %v196_v61, 3  ;;  %vm218_vm11 = vcmp.lt.s32.totalorder %v196_v61, 4  ;;  %v1018_v45 = vsel %vm297_vm7, %v296_v58, 0 }
  0xd3   :  { %v219_v28 = vsel %vm215_vm8, %v199_v20, %v202_v15  ;;  %v220_v31 = vsel %vm218_vm11, %v208_v25, 2102212464  ;;  %v223_v32 = vsel %vm215_vm8, %v202_v15, %v205_v24  ;;  %v224_v33 = vsel %vm218_vm11, %v211_v26, 920167782 }
  0xd4   :  { %v221_v34 = vsel %vm217_vm10, %v205_v24, %v220_v31  ;;  %v225_v35 = vsel %vm217_vm10, %v208_v25, %v224_v33  ;;  %v227_v36 = vsel %vm215_vm8, %v205_v24, %v208_v25  ;;  %v228_v38 = vsel %vm218_vm11, %v214_v27, 1326507024 }
  0xd5   :  { %v226_v43 = vsel %vm216_vm9, %v223_v32, %v225_v35  ;;  %v229_v44 = vsel %vm217_vm10, %v211_v26, %v228_v38  ;;  %v222_v49 = vsel %vm216_vm9, %v219_v28, %v221_v34  ;;  %v434_v53 = vshll.u32 %v908_v63, %v995_v56 }
  0xd6   :  { %v230_v46 = vsel %vm216_vm9, %v227_v36, %v229_v44  ;;  %v1022_v47 = vmul.u32.u64.low %v997_v59, %v226_v43  ;;  %v1023_v48 = vmul.u32.u64.high %v997_v59, %v226_v43, %v1022_v47  ;;  %v435_v54 = vshrl.u32 %v909_v1, %v1003_v3 }
  0xd7   :  { %v1028_v51 = vmul.u32.u64.low %v997_v59, %v230_v46  ;;  %v1029_v50 = vmul.u32.u64.high %v997_v59, %v230_v46, %v1028_v51  ;;  %v437_v55 = vshll.u32 %v909_v1, %v995_v56  ;;  %v438_v57 = vshrl.u32 %v910_v5, %v1003_v3 }
  0xd8   :  { %v440_v58 = vshll.u32 %v910_v5, %v995_v56  ;;  %v441_v61 = vshrl.u32 %v911_v13, %v1003_v3  ;;  %v443_v62 = vshll.u32 %v911_v13, %v995_v56  ;;  %v444_v0 = vshrl.u32 %v912_v18, %v1003_v3 }
  0xd9   :  { %v241_v2 = vadd.s32 1, %v1023_v48  ;;  %v436_v4 = vor.u32 %v435_v54, %v434_v53  ;;  %v439_v12 = vor.u32 %v438_v57, %v437_v55  ;;  %v446_v14 = vshll.u32 %v912_v18, %v995_v56 }
  0xda   :  { %v238_v15 = vmul.u32 %v997_v59, %v222_v49  ;;  %vm240_vm12 = vc.u32 %v1029_v50, %v1022_v47  ;;  %v442_v16 = vor.u32 %v441_v61, %v440_v58  ;;  %v445_v17 = vor.u32 %v444_v0, %v443_v62 }
  0xdb   :  { %v242_v19 = vsel %vm240_vm12, %v241_v2, %v1023_v48  ;;  %v425_v20 = vor.u32 8388608, %v424_v52  ;;  %v433_v21 = vshrl.u32 %v908_v63, %v1003_v3  ;;  %v447_v23 = vshrl.u32 %v913_v22, %v1003_v3 }
  0xdc   :  { %v243_v24 = vadd.s32 %v242_v19, %v238_v15  ;;  %vm449_vm13 = vcmp.lt.s32.totalorder %v1014_v39, 1  ;;  %vm450_vm14 = vcmp.lt.s32.totalorder %v1014_v39, 2  ;;  %vm452_vm15 = vcmp.lt.s32.totalorder %v1014_v39, 4 }
  0xdd   :  { %v448_v56 = vor.u32 %v447_v23, %v446_v14  ;;  %vm451_vm1 = vcmp.lt.s32.totalorder %v1014_v39, 3  ;;  %v457_v59 = vsel %vm449_vm13, %v436_v4, %v439_v12  ;;  %v458_v25 = vsel %vm452_vm15, %v445_v17, 920167782 }
  0xde   :  { %v244_v26 = vadd.s32 536870912, %v243_v24  ;;  %v454_v27 = vsel %vm452_vm15, %v442_v16, 2102212464  ;;  %v459_v28 = vsel %vm451_vm1, %v442_v16, %v458_v25  ;;  %v461_v3 = vsel %vm449_vm13, %v439_v12, %v442_v16 }
  0xdf   :  { %vm531_vm2 = vcmp.gt.s32.totalorder %v530_v42, 0  ;;  %v460_v31 = vsel %vm450_vm14, %v457_v59, %v459_v28  ;;  %v462_v32 = vsel %vm452_vm15, %v448_v56, 1326507024  ;;  %v465_v33 = vshll.u32 %v425_v20, 8 }
  0xe0   :  { %v300_v34 = vand.u32 31, %v1018_v45  ;;  %v1071_v35 = vshrl.u32 %v244_v26, 30  ;;  %v453_v36 = vsel %vm449_vm13, %v433_v21, %v436_v4  ;;  %v463_v38 = vsel %vm451_vm1, %v445_v17, %v462_v32 }
  0xe1   :  { %v455_v43 = vsel %vm451_vm1, %v439_v12, %v454_v27  ;;  %v464_v44 = vsel %vm450_vm14, %v461_v3, %v463_v38  ;;  %v1077_v46 = vmul.u32.u64.low %v465_v33, %v460_v31  ;;  %v1078_v48 = vmul.u32.u64.high %v465_v33, %v460_v31, %v1077_v46 }
  0xe2   :  { %v246_v49 = vshll.u32 %v1071_v35, 30  ;;  %v1082_v51 = vmul.u32.u64.low %v465_v33, %v464_v44  ;;  %v1083_v52 = vmul.u32.u64.high %v465_v33, %v464_v44, %v1082_v51  ;;  %v1085_v53 = vsel %vm531_vm2, %v530_v42, 0 }
  0xe3   :  { %v301_v54 = vsub.s32 32, %v300_v34  ;;  %v456_v57 = vsel %vm450_vm14, %v453_v36, %v455_v43  ;;  %v286_v58 = vand.u32 2147483647, %v989_v41  ;;  %v475_v61 = vadd.s32 1, %v1078_v48 }
  0xe4   :  { %v247_v55 = vsub.s32 %v243_v24, %v246_v49  ;;  %vm474_vm3 = vc.u32 %v1083_v52, %v1077_v46  ;;  %v1094_v0 = vand.u32 31, %v1085_v53  ;;  %v1097_v2 = vshrl.u32 %v1018_v45, 5 }
  0xe5   :  { %v472_v42 = vmul.u32 %v465_v33, %v456_v57  ;;  %v476_v4 = vsel %vm474_vm3, %v475_v61, %v1078_v48  ;;  %v293_v39 = vand.u32 8388607, %v286_v58  ;;  %v304_v14 = vshrl.u32 %v909_v1, %v301_v54 }
  0xe6   :  { %v249_v62 = vsub.s32 0, %v247_v55  ;;  %v307_v15 = vshrl.u32 %v910_v5, %v301_v54  ;;  %v303_v17 = vshll.u32 %v908_v63, %v300_v34  ;;  %v306_v19 = vshll.u32 %v909_v1, %v300_v34 }
  0xe7   :  { %v477_v16 = vadd.s32 %v476_v4, %v472_v42  ;;  %v310_v20 = vshrl.u32 %v911_v13, %v301_v54  ;;  %v312_v21 = vshll.u32 %v911_v13, %v300_v34  ;;  %v313_v23 = vshrl.u32 %v912_v18, %v301_v54 }
  0xe8   :  { %v727_v12 = vmin.u32 %v249_v62, %v247_v55  ;;  %v316_v24 = vshrl.u32 %v913_v22, %v301_v54  ;;  %v239_v56 = vadd.s32 %v1022_v47, %v1029_v50  ;;  %v309_v25 = vshll.u32 %v910_v5, %v300_v34 }
  0xe9   :  { %v478_v59 = vadd.s32 536870912, %v477_v16  ;;  %v315_v26 = vshll.u32 %v912_v18, %v300_v34  ;;  %v305_v28 = vor.u32 %v304_v14, %v303_v17  ;;  %v308_v3 = vor.u32 %v307_v15, %v306_v19 }
  0xea   :  { %v251_v45 = vclz %v727_v12  ;;  %v314_v31 = vor.u32 %v313_v23, %v312_v21  ;;  %v311_v33 = vor.u32 %v310_v20, %v309_v25  ;;  %vm321_vm4 = vcmp.lt.s32.totalorder %v1097_v2, 4 }
  0xeb   :  { %v1114_v32 = vshrl.u32 %v478_v59, 30  ;;  %v317_v36 = vor.u32 %v316_v24, %v315_v26  ;;  %v269_v38 = vsub.s32 4, %v1071_v35  ;;  %v294_v43 = vor.u32 8388608, %v293_v39 }
  0xec   :  { %v728_v27 = vadd.s32 4294967294, %v251_v45  ;;  %v327_v47 = vsel %vm321_vm4, %v314_v31, 920167782  ;;  %vm318_vm6 = vcmp.lt.s32.totalorder %v1097_v2, 1  ;;  %vm319_vm7 = vcmp.lt.s32.totalorder %v1097_v2, 2 }
  0xed   :  { %v480_v34 = vshll.u32 %v1114_v32, 30  ;;  %vm320_vm8 = vcmp.lt.s32.totalorder %v1097_v2, 3  ;;  %v326_v49 = vsel %vm318_vm6, %v305_v28, %v308_v3  ;;  %v330_v61 = vsel %vm318_vm6, %v308_v3, %v311_v33 }
  0xee   :  { %vm729_vm5 = vcmp.lt.s32.totalorder %v728_v27, 0  ;;  %v328_v57 = vsel %vm320_vm8, %v311_v33, %v327_v47  ;;  %v331_v62 = vsel %vm321_vm4, %v317_v36, 1326507024  ;;  %v323_v39 = vsel %vm321_vm4, %v311_v33, 2102212464 }
  0xef   :  { %v254_v50 = vsel %vm729_vm5, 0, %v728_v27  ;;  %v1126_v51 = vsub.s32 %v477_v16, %v480_v34  ;;  %v302_v15 = vshrl.u32 %v908_v63, %v301_v54  ;;  %v329_v16 = vsel %vm319_vm7, %v326_v49, %v328_v57 }
  0xf0   :  { %v255_v44 = vsub.s32 32, %v254_v50  ;;  %v259_v48 = vsub.s32 4294967266, %v254_v50  ;;  %v256_v42 = vshll.u32 %v247_v55, %v254_v50  ;;  %v332_v17 = vsel %vm320_vm8, %v314_v31, %v331_v62 }
  0xf1   :  { %v483_v14 = vsub.s32 0, %v1126_v51  ;;  %v333_v55 = vsel %vm319_vm7, %v330_v61, %v332_v17  ;;  %v334_v45 = vshll.u32 %v294_v43, 8  ;;  %v322_v23 = vsel %vm318_vm6, %v302_v15, %v305_v28 }
  0xf2   :  { %v257_v4 = vshrl.u32 %v239_v56, %v255_v44  ;;  %v260_v12 = vadd.s32 127, %v259_v48  ;;  %v324_v54 = vsel %vm320_vm8, %v308_v3, %v323_v39  ;;  %vm185_vm9 = vcmp.lt.s32.totalorder %v982_v30, 0 }
  0xf3   :  { %v739_v21 = vmin.u32 %v483_v14, %v1126_v51  ;;  %v1150_v56 = vmul.u32.u64.low %v334_v45, %v333_v55  ;;  %v1151_v59 = vmul.u32.u64.high %v334_v45, %v333_v55, %v1150_v56  ;;  %v270_v25 = vsel %vm185_vm9, %v269_v38, %v1071_v35 }
  0xf4   :  { %v258_v19 = vor.u32 %v257_v4, %v256_v42  ;;  %v261_v20 = vshll.u32 %v260_v12, 23  ;;  %v1156_v27 = vmul.u32.u64.low %v334_v45, %v329_v16  ;;  %v1157_v31 = vmul.u32.u64.high %v334_v45, %v329_v16, %v1156_v27 }
  0xf5   :  { %v485_v26 = vclz %v739_v21  ;;  %v1161_v28 = vsub.s32 32, %v1094_v0  ;;  %v325_v36 = vsel %vm319_vm7, %v322_v23, %v324_v54  ;;  %v1166_v43 = vshrl.u32 %v1085_v53, 5 }
  0xf6   :  { %v262_v24 = vor.u32 4788187, %v261_v20  ;;  %v265_v3 = vcvt.s32.f32 %v258_v19  ;;  %vm1170_vm10 = vcmp.le.f32.partialorder %v183_v37, 0.7853982  ;;  %v520_v47 = vand.u32 2147483647, %v987_v40 }
  0xf7   :  { %v740_v38 = vadd.s32 4294967294, %v485_v26  ;;  %v272_v34 = vsel %vm1170_vm10, 0, %v270_v25  ;;  %v473_v2 = vadd.s32 %v1077_v46, %v1083_v52  ;;  %vm343_vm11 = vc.u32 %v1151_v59, %v1156_v27 }
  0xf8   :  { %v263_v33 = vand.u32 2147483647, %v262_v24  ;;  %v341_v53 = vmul.u32 %v334_v45, %v325_v36  ;;  %v344_v37 = vadd.s32 1, %v1157_v31  ;;  %v537_v44 = vshll.u32 %v908_v63, %v1094_v0 }
  0xf9   :  { %vm741_vm12 = vcmp.lt.s32.totalorder %v740_v38, 0  ;;  %v538_v57 = vshrl.u32 %v909_v1, %v1161_v28  ;;  %v540_v61 = vshll.u32 %v909_v1, %v1094_v0  ;;  %v527_v42 = vand.u32 8388607, %v520_v47 }
  0xfa   :  { %v266_v50 = vmul.f32 %v265_v3, %v263_v33  ;;  %v488_v49 = vsel %vm741_vm12, 0, %v740_v38  ;;  %v345_v52 = vsel %vm343_vm11, %v344_v37, %v1157_v31  ;;  %v541_v14 = vshrl.u32 %v910_v5, %v1161_v28  ;;  %v124_v33 = vpop.permute.xlu0 %123 }
  0xfb   :  { %v489_v62 = vsub.s32 32, %v488_v49  ;;  %v493_v46 = vsub.s32 4294967266, %v488_v49  ;;  %v490_v12 = vshll.u32 %v1126_v51, %v488_v49  ;;  %v346_v39 = vadd.s32 %v345_v52, %v341_v53 }
  0xfc   :  { %v267_v48 = vxor.u32 2147483648, %v266_v50  ;;  %v544_v17 = vshrl.u32 %v911_v13, %v1161_v28  ;;  %v546_v20 = vshll.u32 %v911_v13, %v1094_v0  ;;  %v547_v51 = vshrl.u32 %v912_v18, %v1161_v28 }
  0xfd   :  { %v491_v15 = vshrl.u32 %v473_v2, %v489_v62  ;;  %v494_v16 = vadd.s32 127, %v493_v46  ;;  %v347_v19 = vadd.s32 536870912, %v346_v39  ;;  %v543_v21 = vshll.u32 %v910_v5, %v1094_v0  ;;  %v112_v5 = vld [vmem:[#allocation2] sm:$0xff] }
  0xfe   :  { %v268_v4 = vsel %vm185_vm9, %v267_v48, %v266_v50  ;;  %v539_v54 = vor.u32 %v538_v57, %v537_v44  ;;  %v548_v24 = vor.u32 %v547_v51, %v546_v20  ;;  %v550_v56 = vshrl.u32 %v913_v22, %v1161_v28 }
  0xff   :  { %v271_v1 = vsel %vm1170_vm10, %v982_v30, %v268_v4  ;;  %v492_v55 = vor.u32 %v491_v15, %v490_v12  ;;  %v495_v45 = vshll.u32 %v494_v16, 23  ;;  %v1207_v23 = vshrl.u32 %v347_v19, 30 }
 0x100   :  { %801 = vcosq.f32 %v271_v1  ;;  %v542_v26 = vor.u32 %v541_v14, %v540_v61  ;;  %v545_v31 = vor.u32 %v544_v17, %v543_v21  ;;  %v549_v13 = vshll.u32 %v912_v18, %v1094_v0  ;;  %v1230_v0 = vpop.permute.xlu1 %126 }
 0x101   :  { %803 = vsinq.f32 %v271_v1  ;;  %v496_v25 = vor.u32 4788187, %v495_v45  ;;  %v1213_v3 = vand.u32 3, %v272_v34  ;;  %vm1217_vm13 = vcmp.le.f32.partialorder %v417_v60, 0.7853982 }
 0x102   :  { %vm419_vm14 = vcmp.lt.s32.totalorder %v980_v29, 0  ;;  %v349_v36 = vshll.u32 %v1207_v23, 30  ;;  %vm128_vm15 = vcmp.eq.s32.totalorder %v124_v33, 1  ;;  %v499_v35 = vcvt.s32.f32 %v492_v55 }
 0x103   :  { %v497_v22 = vand.u32 2147483647, %v496_v25  ;;  %v551_v38 = vor.u32 %v550_v56, %v549_v13  ;;  %vm555_vm1 = vcmp.lt.s32.totalorder %v1166_v43, 4  ;;  %vm552_vm2 = vcmp.lt.s32.totalorder %v1166_v43, 1 }
 0x104   :  { %v1224_v18 = vsub.s32 %v346_v39, %v349_v36  ;;  %vm554_vm3 = vcmp.lt.s32.totalorder %v1166_v43, 3  ;;  %v561_v60 = vsel %vm555_vm1, %v548_v24, 920167782  ;;  %v528_v34 = vor.u32 8388608, %v527_v42  ;;  %v142_v17 = vpop.permute.xlu1 %141 }
 0x105   :  { %v500_v50 = vmul.f32 %v499_v35, %v497_v22  ;;  %v560_v2 = vsel %vm552_vm2, %v539_v54, %v542_v26  ;;  %v562_v53 = vsel %vm554_vm3, %v545_v31, %v561_v60  ;;  %vm278_vm4 = vcmp.eq.s32.totalorder %v1213_v3, 0 }
 0x106   :  { %vm281_vm5 = vcmp.eq.s32.totalorder %v1213_v3, 2  ;;  %v503_v37 = vsub.s32 4, %v1114_v32  ;;  %v352_v44 = vsub.s32 0, %v1224_v18  ;;  %vm553_vm6 = vcmp.lt.s32.totalorder %v1166_v43, 2 }
 0x107   :  { %v501_v48 = vxor.u32 2147483648, %v500_v50  ;;  %v564_v49 = vsel %vm552_vm2, %v542_v26, %v545_v31  ;;  %v565_v57 = vsel %vm555_vm1, %v551_v38, 1326507024  ;;  %v536_v46 = vshrl.u32 %v908_v63, %v1161_v28 }
 0x108   :  { %v731_v62 = vmin.u32 %v352_v44, %v1224_v18  ;;  %v557_v52 = vsel %vm555_vm1, %v545_v31, 2102212464  ;;  %v563_v42 = vsel %vm553_vm6, %v560_v2, %v562_v53  ;;  %v566_v14 = vsel %vm554_vm3, %v548_v24, %v565_v57 }
 0x109   :  { %v502_v39 = vsel %vm419_vm14, %v501_v48, %v500_v50  ;;  %v568_v1 = vshll.u32 %v528_v34, 8  ;;  %v567_v16 = vsel %vm553_vm6, %v564_v49, %v566_v14  ;;  %v504_v19 = vsel %vm419_vm14, %v503_v37, %v1114_v32 }
 0x10a   :  { %v802_v61 = vpop.eup %801  ;;  %v505_v63 = vsel %vm1217_vm13, %v980_v29, %v502_v39  ;;  %v354_v28 = vclz %v731_v62  ;;  %v556_v45 = vsel %vm552_vm2, %v536_v46, %v539_v54  ;;  %v558_v21 = vsel %vm554_vm3, %v542_v26, %v557_v52 }
 0x10b   :  { %v804_v4 = vpop.eup %803  ;;  %v282_v12 = vxor.u32 2147483648, %v802_v61  ;;  %805 = vcosq.f32 %v505_v63  ;;  %v1264_v20 = vmul.u32.u64.low %v568_v1, %v567_v16  ;;  %v1265_v51 = vmul.u32.u64.high %v568_v1, %v567_v16, %v1264_v20 }
 0x10c   :  { %v279_v15 = vxor.u32 2147483648, %v804_v4  ;;  %807 = vsinq.f32 %v505_v63  ;;  %v732_v55 = vadd.s32 4294967294, %v354_v28  ;;  %v134_v31 = vsel %vm128_vm15, %v969_v10, %v967_v9 }
 0x10d   :  { %v283_v56 = vsel %vm281_vm5, %v282_v12, %v804_v4  ;;  %v1275_v25 = vmul.u32.u64.low %v568_v1, %v563_v42  ;;  %v1276_v32 = vmul.u32.u64.high %v568_v1, %v563_v42, %v1275_v25  ;;  %vm146_vm7 = vcmp.eq.s32.totalorder %v142_v17, 1 }
 0x10e   :  { %v280_v24 = vsel %vm278_vm4, %v802_v61, %v279_v15  ;;  %vm277_vm8 = vcmp.lt.s32.totalorder %v1213_v3, 2  ;;  %vm733_vm9 = vcmp.lt.s32.totalorder %v732_v55, 0  ;;  %v506_v54 = vsel %vm1217_vm13, 0, %v504_v19 }
 0x10f   :  { %v342_v26 = vadd.s32 %v1156_v27, %v1151_v59  ;;  %v357_v13 = vsel %vm733_vm9, 0, %v732_v55  ;;  %v559_v36 = vsel %vm553_vm6, %v556_v45, %v558_v21  ;;  %v284_v22 = vsel %vm277_vm8, %v280_v24, %v283_v56 }
 0x110   :  { %v358_v35 = vsub.s32 32, %v357_v13  ;;  %v362_v38 = vsub.s32 4294967266, %v357_v13  ;;  %vm577_vm10 = vc.u32 %v1265_v51, %v1275_v25  ;;  %v152_v33 = vsel %vm146_vm7, %v971_v11, %v134_v31 }
 0x111   :  { %vm275_vm11 = vweird.f32 %v982_v30  ;;  %v578_v3 = vadd.s32 1, %v1276_v32  ;;  %v359_v60 = vshll.u32 %v1224_v18, %v357_v13  ;;  %v575_v50 = vmul.u32 %v568_v1, %v559_v36 }
 0x112   :  { %v360_v59 = vshrl.u32 %v342_v26, %v358_v35  ;;  %v363_v27 = vadd.s32 127, %v362_v38  ;;  %vm182_vm12 = vcmp.eq.s32.totalorder %v965_v8, 0  ;;  %v285_v43 = vsel %vm275_vm11, nan, %v284_v22 }
 0x113   :  { %v510_v34 = vand.u32 3, %v506_v54  ;;  %v579_v2 = vsel %vm577_vm10, %v578_v3, %v1276_v32  ;;  %v154_v49 = vadd.f32 %v152_v33, %v112_v5  ;;  %v389_v61 = vsel %vm182_vm12, %v982_v30, %v285_v43 }
 0x114   :  { %v361_v53 = vor.u32 %v360_v59, %v359_v60  ;;  %v364_v37 = vshll.u32 %v363_v27, 23  ;;  %v580_v44 = vadd.s32 %v579_v2, %v575_v50  ;;  %vm509_vm1 = vweird.f32 %v980_v29 }
 0x115   :  { %v806_v48 = vpop.eup %805  ;;  %vm512_vm13 = vcmp.eq.s32.totalorder %v510_v34, 0  ;;  %vm515_vm14 = vcmp.eq.s32.totalorder %v510_v34, 2  ;;  %v391_v14 = vadd.f32 %v389_v61, %v154_v49  ;;  %vm511_vm15 = vcmp.lt.s32.totalorder %v510_v34, 2 }
 0x116   :  { %v808_v57 = vpop.eup %807  ;;  %v516_v18 = vxor.u32 2147483648, %v806_v48  ;;  %v365_v62 = vor.u32 4788187, %v364_v37  ;;  %v581_v46 = vadd.s32 536870912, %v580_v44  ;;  %v368_v12 = vcvt.s32.f32 %v361_v53 }
 0x117   :  { %v513_v52 = vxor.u32 2147483648, %v808_v57  ;;  %vm288_vm2 = vcmp.lt.s32.totalorder %v989_v41, 0  ;;  %vm1314_vm3 = vcmp.le.f32.partialorder %v286_v58, 0.7853982  ;;  %v576_v26 = vadd.s32 %v1275_v25, %v1265_v51 }
 0x118   :  { %v517_v42 = vsel %vm515_vm14, %v516_v18, %v808_v57  ;;  %v366_v4 = vand.u32 2147483647, %v365_v62  ;;  %v582_v39 = vshrl.u32 %v581_v46, 30  ;;  %v372_v38 = vsub.s32 4, %v1207_v23  ;;  %v145_v18 = vpop.permute.xlu0 %144 }
 0x119   :  { %v514_v1 = vsel %vm512_vm13, %v806_v48, %v513_v52  ;;  %vm1331_vm5 = vcmp.le.f32.partialorder %v520_v47, 0.7853982  ;;  %vm522_vm6 = vcmp.lt.s32.totalorder %v987_v40, 0  ;;  %vm129_vm9 = vcmp.eq.s32.totalorder %v1230_v0, 1 }
 0x11a   :  { %v518_v15 = vsel %vm511_vm15, %v514_v1, %v517_v42  ;;  %v369_v63 = vmul.f32 %v368_v12, %v366_v4  ;;  %v583_v28 = vshll.u32 %v582_v39, 30  ;;  %v373_v60 = vsel %vm288_vm2, %v372_v38, %v1207_v23  ;;  %v113_v12 = vld [vmem:[#allocation2 + $0x8] sm:$0xff] }
 0x11b   :  { %v519_v16 = vsel %vm509_vm1, nan, %v518_v15  ;;  %v375_v51 = vsel %vm1314_vm3, 0, %v373_v60  ;;  %v606_v48 = vsub.s32 4, %v582_v39  ;;  %v135_v52 = vsel %vm129_vm9, %v969_v10, %v967_v9 }
 0x11c   :  { %v623_v30 = vsel %vm182_vm12, %v980_v29, %v519_v16  ;;  %v584_v17 = vsub.s32 %v580_v44, %v583_v28  ;;  %v370_v20 = vxor.u32 2147483648, %v369_v63  ;;  %v379_v2 = vand.u32 3, %v375_v51 }
 0x11d   :  { %v625_v19 = vadd.f32 %v623_v30, %v391_v14  ;;  %v607_v47 = vsel %vm522_vm6, %v606_v48, %v582_v39  ;;  %vm147_vm11 = vcmp.eq.s32.totalorder %v145_v18, 1  ;;  %vm378_vm13 = vweird.f32 %v989_v41 }
 0x11e   :  { %v586_v55 = vsub.s32 0, %v584_v17  ;;  %v371_v24 = vsel %vm288_vm2, %v370_v20, %v369_v63  ;;  %vm381_vm7 = vcmp.eq.s32.totalorder %v379_v2, 0  ;;  %vm384_vm8 = vcmp.eq.s32.totalorder %v379_v2, 2 }
 0x11f   :  { %v1306_v45 = vsel %vm91_vm0, %v625_v19, 0.0  ;;  %v374_v31 = vsel %vm1314_vm3, %v989_v41, %v371_v24  ;;  %vm380_vm10 = vcmp.lt.s32.totalorder %v379_v2, 2  ;;  %v609_v46 = vsel %vm1331_vm5, 0, %v607_v47 }
 0x120   :  { %629 = vadd.xlane.f32.xlu1 %v1306_v45  ;;  %v743_v21 = vmin.u32 %v586_v55, %v584_v17  ;;  %809 = vcosq.f32 %v374_v31  ;;  %v613_v4 = vand.u32 3, %v609_v46  ;;  %v153_v14 = vsel %vm147_vm11, %v971_v11, %v135_v52 }
 0x121   :  { %811 = vsinq.f32 %v374_v31  ;;  %v155_v63 = vadd.f32 %v153_v14, %v113_v12  ;;  %vm612_vm2 = vweird.f32 %v987_v40 }
 0x122   :  { %v588_v56 = vclz %v743_v21  ;;  %vm618_vm14 = vcmp.eq.s32.totalorder %v613_v4, 2  ;;  %vm615_vm15 = vcmp.eq.s32.totalorder %v613_v4, 0  ;;  %vm614_vm1 = vcmp.lt.s32.totalorder %v613_v4, 2 }
 0x124   :  { %v744_v32 = vadd.s32 4294967294, %v588_v56 }
 0x126   :  { %vm745_vm4 = vcmp.lt.s32.totalorder %v744_v32, 0 }
 0x127   :  { %v591_v54 = vsel %vm745_vm4, 0, %v744_v32 }
 0x128   :  { %v592_v13 = vsub.s32 32, %v591_v54  ;;  %v596_v36 = vsub.s32 4294967266, %v591_v54  ;;  %v593_v22 = vshll.u32 %v584_v17, %v591_v54 }
 0x12a   :  { %v594_v35 = vshrl.u32 %v576_v26, %v592_v13  ;;  %v597_v58 = vadd.s32 127, %v596_v36  ;;  %v810_v50 = vpop.eup %809 }
 0x12b   :  { %v812_v43 = vpop.eup %811  ;;  %v385_v23 = vxor.u32 2147483648, %v810_v50 }
 0x12c   :  { %v595_v33 = vor.u32 %v594_v35, %v593_v22  ;;  %v598_v3 = vshll.u32 %v597_v58, 23  ;;  %v382_v37 = vxor.u32 2147483648, %v812_v43 }
 0x12d   :  { %v386_v61 = vsel %vm384_vm8, %v385_v23, %v812_v43 }
 0x12e   :  { %v599_v5 = vor.u32 4788187, %v598_v3  ;;  %v602_v27 = vcvt.s32.f32 %v595_v33  ;;  %v383_v57 = vsel %vm381_vm7, %v810_v50, %v382_v37 }
 0x12f   :  { %v387_v62 = vsel %vm380_vm10, %v383_v57, %v386_v61 }
 0x130   :  { %v600_v59 = vand.u32 2147483647, %v599_v5  ;;  %v388_v42 = vsel %vm378_vm13, nan, %v387_v62 }
 0x131   :  { %v390_v0 = vsel %vm182_vm12, %v989_v41, %v388_v42 }
 0x132   :  { %v603_v25 = vmul.f32 %v602_v27, %v600_v59  ;;  %v392_v10 = vadd.f32 %v390_v0, %v155_v63 }
 0x134   :  { %v604_v34 = vxor.u32 2147483648, %v603_v25 }
 0x136   :  { %v605_v44 = vsel %vm522_vm6, %v604_v34, %v603_v25 }
 0x137   :  { %v608_v49 = vsel %vm1331_vm5, %v987_v40, %v605_v44 }
 0x138   :  { %813 = vcosq.f32 %v608_v49 }
 0x139   :  { %815 = vsinq.f32 %v608_v49 }
 0x142   :  { %v814_v39 = vpop.eup %813 }
 0x143   :  { %v816_v1 = vpop.eup %815  ;;  %v619_v15 = vxor.u32 2147483648, %v814_v39 }
 0x144   :  { %v616_v28 = vxor.u32 2147483648, %v816_v1 }
 0x145   :  { %v620_v9 = vsel %vm618_vm14, %v619_v15, %v816_v1 }
 0x146   :  { %v617_v16 = vsel %vm615_vm15, %v814_v39, %v616_v28 }
 0x147   :  { %v621_v30 = vsel %vm614_vm1, %v617_v16, %v620_v9 }
 0x148   :  { %v622_v17 = vsel %vm612_vm2, nan, %v621_v30 }
 0x149   :  { %v624_v11 = vsel %vm182_vm12, %v987_v40, %v622_v17 }
 0x14a   :  { %v626_v19 = vadd.f32 %v624_v11, %v392_v10 }
 0x14c   :  { %v628_v41 = vsel %vm91_vm0, %v626_v19, 0.0 }
 0x14d   :  { %631 = vadd.xlane.f32.xlu0 %v628_v41 }
 0x1ad   :  { %v630_v20 = vpop.xlane.xlu1 %629 }
 0x1ae   :  { %v633_v55 = vmul.f32 0.03125, %v630_v20 }
 0x1b0   :  { %v635_v21 = vsub.f32 %v1306_v45, %v633_v55 }
 0x1b2   :  { %v637_v24 = vsel %vm91_vm0, %v635_v21, 0.0 }
 0x1b3   :  { %v639_v56 = vmul.f32 %v637_v24, %v637_v24 }
 0x1b5   :  { %641 = vadd.xlane.f32.xlu0 %v639_v56 }
 0x1da   :  { %v632_v29 = vpop.xlane.xlu0 %631 }
 0x1db   :  { %v634_v32 = vmul.f32 0.03125, %v632_v29 }
 0x1dd   :  { %v636_v31 = vsub.f32 %v628_v41, %v634_v32 }
 0x1df   :  { %v638_v40 = vsel %vm91_vm0, %v636_v31, 0.0 }
 0x1e0   :  { %v640_v54 = vmul.f32 %v638_v40, %v638_v40 }
 0x1e2   :  { %643 = vadd.xlane.f32.xlu1 %v640_v54 }
 0x242   :  { %v642_v26 = vpop.xlane.xlu0 %641 }
 0x243   :  { %v645_v13 = vmul.f32 0.03125, %v642_v26 }
 0x245   :  { %v647_v36 = vadd.f32 1e-12, %v645_v13 }
 0x247   :  { %817 = vrsqrt.f32 %v647_v36 }
 0x251   :  { %v818_v22 = vpop.eup %817 }
 0x252   :  { %v651_v35 = vmul.f32 %v818_v22, %v637_v24 }
 0x254   :  { %v657_v45 = vmul.f32 %v961_v6, %v651_v35 }
 0x256   :  { %v663_v58 = vadd.f32 %v963_v7, %v657_v45 }
 0x258   :  { %665 = vst [vmem:[#allocation9] sm:$0xff] %v663_v58 }
 0x26f   :  { %v644_v38 = vpop.xlane.xlu1 %643 }
 0x270   :  { %v646_v33 = vmul.f32 0.03125, %v644_v38 }
 0x272   :  { %v648_v3 = vadd.f32 1e-12, %v646_v33 }
 0x274   :  { %819 = vrsqrt.f32 %v648_v3 }
 0x27e   :  { %v820_v5 = vpop.eup %819 }
 0x27f   :  { %v652_v8 = vmul.f32 %v820_v5, %v638_v40 }
 0x281   :  { %v658_v60 = vmul.f32 %v961_v6, %v652_v8 }
 0x283   :  { %v664_v59 = vadd.f32 %v963_v7, %v658_v60 }
 0x285   :  { %666 = vst [vmem:[#allocation9 + $0x8] sm:$0xff] %v664_v59 }
 0x286   :  { %866 = shalt.err (!%p863_p5)
}
 0x287   :  { %s867_s20 = scalar_lea.hbm %s1383_s4, 256 }
 0x288   :  { %p868_p6 = scmp.ne.s32.totalorder %s1383_s4, %s867_s20  ;;  %p871_p7 = scmp.lt.u32.totalorder %s867_s20, %s1383_s4 }
 0x28a   :  { %p873_p8 = pnand %p871_p7, %p868_p6 }
 0x28c   :  { %876 = shalt.err (!%p873_p8)
}
 0x28d   :  { %678 = dma.vmem_to_hbm [thread:$0]  %s673_s16, 256, %s1383_s4, [#allocation8], %s903_s29, %s903_s29, %s904_s30  }
 0x28e   :  { %891 = dma.done.wait [#allocation8], 256  }
 0x28f   :  { %892 = vsyncadd [#allocation8], 4294967040 }
 0x290   :  { %682 = vsyncpa [#allocation7], 1 }
 0x291   :  { %683 = vsyncpa [#allocation8], 1 }
 0x292   :  { %684 = vsyncmov [#allocation3] }
 0x295   :  { %s685_s26 = vpop.sfrf %684 }
 0x296   :  { %p748_p9 = scmp.ne.s32.totalorder %s685_s26, 0 }
 0x298   :  { %689 = shalt.err (%p748_p9)  }
 0x299   :  { %691 = vsyncmov [#allocation3 + $0x1] }
 0x29c   :  { %s692_s27 = vpop.sfrf %691 }
 0x29d   :  { %p749_p10 = scmp.ne.s32.totalorder %s692_s27, 0 }
 0x29f   :  { %696 = shalt.err (%p749_p10)  }

</bundles_post_ra>
